<compile_context>
chip_gen: v5e
topology: v5e:2x2
jax: 0.10.0
libtpu: 0.0.40
codegen_flags: <defaults>
</compile_context>

<pallas_src>
import functools

import jax
import jax.numpy as jnp
from jax import lax
from jax.experimental import pallas as pl
from jax.experimental.pallas import tpu as pltpu


def _round_up(x, m):
    return ((x + m - 1) // m) * m


# Stays under v7x's 64 MiB physical VMEM with headroom; also valid on v5e/v6e.
_VMEM_LIMIT = 48 * 1024 * 1024

# Propagation matmul tiles (bf16 operands): 256x256 A tile + 256x128 E tile +
# double buffering + f32 accumulator is well under budget on every generation.
_TM_P, _TK_P, _TN_P = 256, 256, 128
# Item-tile width for the score/loss kernel (lane-dense, multiple of 128).
_TILE_ITEMS = 256


# ----------------------------------------------------------------------------
# Kernel 1: tiled bf16 matmul with f32 accumulator (LightGCN propagation step)
# ----------------------------------------------------------------------------
def matmul_kernel(a_ref, b_ref, o_ref, acc_ref):
    @pl.when(pl.program_id(2) == 0)
    def _():
        acc_ref[...] = jnp.zeros_like(acc_ref)

    acc_ref[...] += jnp.dot(a_ref[...], b_ref[...],
                            preferred_element_type=jnp.float32)

    @pl.when(pl.program_id(2) == pl.num_programs(2) - 1)
    def _():
        o_ref[...] = acc_ref[...]


def tiled_matmul(a_bf16, b_bf16, *, tm, tn, tk):
    M, K = a_bf16.shape
    _, N = b_bf16.shape
    return pl.pallas_call(
        matmul_kernel,
        out_shape=jax.ShapeDtypeStruct((M, N), jnp.float32),
        grid=(M // tm, N // tn, K // tk),
        in_specs=[
            pl.BlockSpec((tm, tk), lambda i, j, k: (i, k)),
            pl.BlockSpec((tk, tn), lambda i, j, k: (k, j)),
        ],
        out_specs=pl.BlockSpec((tm, tn), lambda i, j, k: (i, j)),
        scratch_shapes=[pltpu.VMEM((tm, tn), jnp.float32)],
        compiler_params=pltpu.CompilerParams(
            dimension_semantics=("parallel", "parallel", "arbitrary"),
            vmem_limit_bytes=_VMEM_LIMIT),
    )(a_bf16, b_bf16)


def lightgcn_propagate(adj, emb, num_layers, *, tm=_TM_P, tk=_TK_P, tn=_TN_P):
    """mean_{l=0..L} A^l @ E0 via one tiled MXU matmul per layer."""
    N, d = emb.shape
    n_pad = _round_up(N, max(tm, tk))
    d_pad = _round_up(d, tn)

    adj_p = jnp.zeros((n_pad, n_pad), jnp.float32).at[:N, :N].set(adj)
    adj_bf = adj_p.astype(jnp.bfloat16)
    e = jnp.zeros((n_pad, d_pad), jnp.float32).at[:N, :d].set(emb)

    acc = e  # running layer sum, kept in f32
    for _ in range(num_layers):
        e = tiled_matmul(adj_bf, e.astype(jnp.bfloat16), tm=tm, tn=tn, tk=tk)
        acc = acc + e
    return (acc / jnp.float32(num_layers + 1))[:N, :d]


# ----------------------------------------------------------------------------
# Kernel 2: scores = pred @ item_latent.T + online logsumexp + label pick
# ----------------------------------------------------------------------------
def score_loss_kernel(pred_ref, itemT_ref, lbl_ref, out_ref,
                      m_scr, l_scr, p_scr, *, n_items, tile_items):
    j = pl.program_id(0)

    @pl.when(j == 0)
    def _():
        m_scr[...] = jnp.full_like(m_scr, -1e30)
        l_scr[...] = jnp.zeros_like(l_scr)
        p_scr[...] = jnp.zeros_like(p_scr)

    # (B_pad, tile_items) score tile; RHS is pre-transposed so no in-kernel .T
    s = jnp.dot(pred_ref[...], itemT_ref[...],
                preferred_element_type=jnp.float32)

    col = j * tile_items + lax.broadcasted_iota(jnp.int32, s.shape, 1)
    s = jnp.where(col < n_items, s, -1e30)          # mask padded item columns

    # online logsumexp (flash-style)
    m_prev = m_scr[...]
    m_new = jnp.maximum(m_prev, jnp.max(s, axis=1, keepdims=True))
    l_scr[...] = (jnp.exp(m_prev - m_new) * l_scr[...]
                  + jnp.sum(jnp.exp(s - m_new), axis=1, keepdims=True))
    m_scr[...] = m_new

    # accumulate the score at the label position (labels hit valid columns)
    p_scr[...] += jnp.sum(jnp.where(col == lbl_ref[...], s, 0.0),
                          axis=1, keepdims=True)

    @pl.when(j == pl.num_programs(0) - 1)
    def _():
        # per-row cross-entropy term: logsumexp(scores) - scores[label]
        out_ref[...] = m_scr[...] + jnp.log(l_scr[...]) - p_scr[...]


def score_and_loss(pred, item_latent, labels, *, tile_items=_TILE_ITEMS):
    B, d = pred.shape
    n_items = item_latent.shape[0]

    b_pad = _round_up(B, 8)
    d_pad = _round_up(d, 128)
    ni_pad = _round_up(n_items, tile_items)

    pred_p = (jnp.zeros((b_pad, d_pad), jnp.float32)
              .at[:B, :d].set(pred).astype(jnp.bfloat16))
    itemT_p = (jnp.zeros((d_pad, ni_pad), jnp.float32)
               .at[:d, :n_items].set(item_latent.T).astype(jnp.bfloat16))
    lbl_p = jnp.zeros((b_pad, 1), jnp.int32).at[:B, 0].set(labels.astype(jnp.int32))

    loss_vec = pl.pallas_call(
        functools.partial(score_loss_kernel,
                          n_items=n_items, tile_items=tile_items),
        out_shape=jax.ShapeDtypeStruct((b_pad, 1), jnp.float32),
        grid=(ni_pad // tile_items,),
        in_specs=[
            pl.BlockSpec((b_pad, d_pad), lambda j: (0, 0)),
            pl.BlockSpec((d_pad, tile_items), lambda j: (0, j)),
            pl.BlockSpec((b_pad, 1), lambda j: (0, 0)),
        ],
        out_specs=pl.BlockSpec((b_pad, 1), lambda j: (0, 0)),
        scratch_shapes=[pltpu.VMEM((b_pad, 1), jnp.float32)] * 3,
        compiler_params=pltpu.CompilerParams(
            dimension_semantics=("arbitrary",),
            vmem_limit_bytes=_VMEM_LIMIT),
    )(pred_p, itemT_p, lbl_p)

    return jnp.mean(loss_vec[:B, 0])


# ----------------------------------------------------------------------------
# LightGCN forward (glue + kernels)
# ----------------------------------------------------------------------------
def lightgcn_forward(params, adj_norm, interactions, num_layers):
    user_w = params["user_emb"]          # (n_users, d)
    item_w = params["item_emb"]          # (1 + n_items, d), row 0 == 0 (pad)
    n_users = user_w.shape[0]

    user_seqs = interactions["user_seqs"].astype(jnp.int32)    # (B,)
    his_seqs = interactions["his_seqs"].astype(jnp.int32)      # (B, L)
    next_items = interactions["next_items"].astype(jnp.int32)  # (B,)

    # encode_users_items
    all_emb = jnp.concatenate([user_w, item_w[1:]], axis=0)    # (N, d)
    all_lat = lightgcn_propagate(adj_norm, all_emb, num_layers)
    user_latent = all_lat[:n_users]
    item_latent = all_lat[n_users:]

    # history mean + user embed (tiny, data-dependent -> JAX glue)
    his_gathered = jnp.take(item_w, his_seqs, axis=0)          # (B, L, d)
    cnt = jnp.sum((his_seqs != 0).astype(jnp.float32), axis=1, keepdims=True)
    cnt = jnp.maximum(cnt, 1.0)                                # guard empty history
    his_embed = jnp.sum(his_gathered, axis=1) / cnt            # (B, d)
    user_embed = jnp.take(user_latent, user_seqs, axis=0)      # (B, d)
    # TODO(synk): nn.Dropout(0.1) training-mode stochasticity is not applied
    # (eval-mode identity).
    pred = user_embed + his_embed

    labels = next_items - 1
    return score_and_loss(pred, item_latent, labels)


# ----------------------------------------------------------------------------
# Pure-JAX references
# ----------------------------------------------------------------------------
def _ref_common_tail(item_w, user_latent, item_latent, user_seqs, his_seqs,
                     next_items, scores_fn):
    his_gath = jnp.take(item_w, his_seqs, axis=0)
    cnt = jnp.maximum(
        jnp.sum((his_seqs != 0).astype(jnp.float32), axis=1, keepdims=True), 1.0)
    his_embed = jnp.sum(his_gath, axis=1) / cnt
    pred = jnp.take(user_latent, user_seqs, axis=0) + his_embed
    scores = scores_fn(pred, item_latent)
    labels = next_items - 1
    logz = jax.nn.logsumexp(scores, axis=1)
    picked = jnp.take_along_axis(scores, labels[:, None], axis=1)[:, 0]
    return jnp.mean(logz - picked)


def lightgcn_forward_ref_f32(params, adj_norm, interactions, num_layers):
    user_w, item_w = params["user_emb"], params["item_emb"]
    n_users = user_w.shape[0]
    all_emb = jnp.concatenate([user_w, item_w[1:]], axis=0)
    e, acc = all_emb, all_emb
    for _ in range(num_layers):
        e = adj_norm @ e
        acc = acc + e
    all_lat = acc / jnp.float32(num_layers + 1)
    return _ref_common_tail(
        item_w, all_lat[:n_users], all_lat[n_users:],
        interactions["user_seqs"].astype(jnp.int32),
        interactions["his_seqs"].astype(jnp.int32),
        interactions["next_items"].astype(jnp.int32),
        lambda p, it: p @ it.T)


def lightgcn_forward_ref_bf16(params, adj_norm, interactions, num_layers):
    # Mirrors the kernels' bf16 matmul casts (f32 accumulation) for a tight check.
    user_w, item_w = params["user_emb"], params["item_emb"]
    n_users = user_w.shape[0]
    all_emb = jnp.concatenate([user_w, item_w[1:]], axis=0)
    adj_bf = adj_norm.astype(jnp.bfloat16)
    e, acc = all_emb, all_emb
    for _ in range(num_layers):
        e = jnp.dot(adj_bf, e.astype(jnp.bfloat16),
                    preferred_element_type=jnp.float32)
        acc = acc + e
    all_lat = acc / jnp.float32(num_layers + 1)
    return _ref_common_tail(
        item_w, all_lat[:n_users], all_lat[n_users:],
        interactions["user_seqs"].astype(jnp.int32),
        interactions["his_seqs"].astype(jnp.int32),
        interactions["next_items"].astype(jnp.int32),
        lambda p, it: jnp.dot(p.astype(jnp.bfloat16),
                              it.T.astype(jnp.bfloat16),
                              preferred_element_type=jnp.float32))


if __name__ == "__main__":
    # small, deterministic synthetic setup
    n_users, n_items, d_model = 8, 24, 32
    num_layers = 2
    B, L = 4, 8
    N = n_users + n_items

    key = jax.random.PRNGKey(0)
    k_user, k_item, k_adj, k_us, k_his, k_len, k_next = jax.random.split(key, 7)

    # Embedding tables (nn.Embedding init ~ N(0,1); padding row zeroed)
    user_w = jax.random.normal(k_user, (n_users, d_model), dtype=jnp.float32)
    item_w = jax.random.normal(k_item, (1 + n_items, d_model), dtype=jnp.float32)
    item_w = item_w.at[0].set(0.0)
    params = {"user_emb": user_w, "item_emb": item_w}

    # Synthetic interaction matrix -> symmetric normalized dense adjacency (N, N)
    R = (jax.random.uniform(k_adj, (n_users, n_items)) < 0.3).astype(jnp.float32)
    A = jnp.zeros((N, N), dtype=jnp.float32)
    A = A.at[:n_users, n_users:].set(R)
    A = A.at[n_users:, :n_users].set(R.T)
    deg = jnp.sum(A, axis=1)
    d_inv_sqrt = jnp.where(deg > 0, 1.0 / jnp.sqrt(deg), 0.0)
    adj_norm = d_inv_sqrt[:, None] * A * d_inv_sqrt[None, :]

    # Synthetic batch
    user_seqs = jax.random.randint(k_us, (B,), 0, n_users, dtype=jnp.int32)
    his_full = jax.random.randint(k_his, (B, L), 1, n_items + 1, dtype=jnp.int32)
    lengths = jax.random.randint(k_len, (B,), 1, L + 1, dtype=jnp.int32)
    pos = jnp.arange(L, dtype=jnp.int32)[None, :]
    his_seqs = jnp.where(pos < lengths[:, None], his_full, 0)  # pad with 0
    next_items = jax.random.randint(k_next, (B,), 1, n_items + 1, dtype=jnp.int32)

    interactions = {
        "user_seqs": user_seqs,
        "his_seqs": his_seqs,
        "next_items": next_items,
    }

    fwd = jax.jit(functools.partial(lightgcn_forward, num_layers=num_layers))
    loss = jax.block_until_ready(fwd(params, adj_norm, interactions))

    # Tight check against a reference that mirrors the kernels' bf16 casts.
    loss_bf16 = lightgcn_forward_ref_bf16(params, adj_norm, interactions, num_layers)
    assert jnp.allclose(loss, loss_bf16, atol=5e-3, rtol=5e-3), (loss, loss_bf16)

    # Loose sanity check against the pure-f32 reference (bf16 quantization only).
    loss_f32 = lightgcn_forward_ref_f32(params, adj_norm, interactions, num_layers)
    assert jnp.allclose(loss, loss_f32, atol=1e-1, rtol=1e-1), (loss, loss_f32)

    print("KERNEL_OK")
</pallas_src>

<mosaic_0001>
module attributes {stable_mosaic.version = 11 : i64} {
  func.func @matmul_kernel(%arg0: i32, %arg1: i32, %arg2: i32, %arg3: memref<256x256xbf16, #tpu.memory_space<vmem>>, %arg4: memref<256x128xbf16, #tpu.memory_space<vmem>>, %arg5: memref<256x128xf32, #tpu.memory_space<vmem>>, %arg6: memref<256x128xf32, #tpu.memory_space<vmem>>) attributes {dimension_semantics = [#tpu.dimension_semantics<parallel>, #tpu.dimension_semantics<parallel>, #tpu.dimension_semantics<arbitrary>], iteration_bounds = array<i64: 1, 1, 1>, scalar_prefetch = 0 : i64, scratch_operands = 1 : i64, tpu.core_type = #tpu.core_type<tc>, window_params = [{transform_indices = @transform_0, window_bounds = array<i64: 256, 256>}, {transform_indices = @transform_1, window_bounds = array<i64: 256, 128>}, {transform_indices = @transform_2, window_bounds = array<i64: 256, 128>}]} {
    %c0_i32 = arith.constant 0 : i32
    %0 = arith.cmpi eq, %arg2, %c0_i32 : i32
    %1 = arith.extui %0 : i1 to i32
    %c0_i32_0 = arith.constant 0 : i32
    %2 = arith.cmpi ne, %1, %c0_i32_0 : i32
    scf.if %2 {
      %cst_10 = arith.constant 0.000000e+00 : f32
      %12 = vector.broadcast %cst_10 : f32 to vector<256x128xf32>
      %c0_11 = arith.constant 0 : index
      %c0_12 = arith.constant 0 : index
      %13 = vector.load %arg6[%c0_11, %c0_12] : memref<256x128xf32, #tpu.memory_space<vmem>>, vector<256x128xf32>
      tpu.vector_store %arg6[%c0_11, %c0_12], %12 {strides = array<i32>} : memref<256x128xf32, #tpu.memory_space<vmem>>, vector<256x128xf32>,
    } else {
    }
    %c0 = arith.constant 0 : index
    %c0_1 = arith.constant 0 : index
    %3 = vector.load %arg6[%c0, %c0_1] : memref<256x128xf32, #tpu.memory_space<vmem>>, vector<256x128xf32>
    %c0_2 = arith.constant 0 : index
    %c0_3 = arith.constant 0 : index
    %4 = vector.load %arg3[%c0_2, %c0_3] : memref<256x256xbf16, #tpu.memory_space<vmem>>, vector<256x256xbf16>
    %c0_4 = arith.constant 0 : index
    %c0_5 = arith.constant 0 : index
    %5 = vector.load %arg4[%c0_4, %c0_5] : memref<256x128xbf16, #tpu.memory_space<vmem>>, vector<256x128xbf16>
    %cst = arith.constant dense<0.000000e+00> : vector<256x128xf32>
    %6 = tpu.matmul %4, %5, %cst {dimension_numbers = #tpu.dot_dimension_numbers<[1], [0], [0], [1], [0, 0, 1, 1], [], []>} : vector<256x256xbf16>, vector<256x128xbf16>, vector<256x128xf32> -> vector<256x128xf32>
    %7 = arith.addf %3, %6 : vector<256x128xf32>
    %c0_6 = arith.constant 0 : index
    %c0_7 = arith.constant 0 : index
    %8 = vector.load %arg6[%c0_6, %c0_7] : memref<256x128xf32, #tpu.memory_space<vmem>>, vector<256x128xf32>
    tpu.vector_store %arg6[%c0_6, %c0_7], %7 {strides = array<i32>} : memref<256x128xf32, #tpu.memory_space<vmem>>, vector<256x128xf32>,
    %c0_i32_8 = arith.constant 0 : i32
    %9 = arith.cmpi eq, %arg2, %c0_i32_8 : i32
    %10 = arith.extui %9 : i1 to i32
    %c0_i32_9 = arith.constant 0 : i32
    %11 = arith.cmpi ne, %10, %c0_i32_9 : i32
    scf.if %11 {
      %c0_10 = arith.constant 0 : index
      %c0_11 = arith.constant 0 : index
      %12 = vector.load %arg6[%c0_10, %c0_11] : memref<256x128xf32, #tpu.memory_space<vmem>>, vector<256x128xf32>
      %c0_12 = arith.constant 0 : index
      %c0_13 = arith.constant 0 : index
      %13 = vector.load %arg5[%c0_12, %c0_13] : memref<256x128xf32, #tpu.memory_space<vmem>>, vector<256x128xf32>
      tpu.vector_store %arg5[%c0_12, %c0_13], %12 {strides = array<i32>} : memref<256x128xf32, #tpu.memory_space<vmem>>, vector<256x128xf32>,
    } else {
    }
    return
  }
  func.func @transform_0(%arg0: i32, %arg1: i32, %arg2: i32) -> (i32, i32) {
    %c0_i32 = arith.constant 0 : i32
    return %arg0, %arg2 : i32, i32
  }
  func.func @transform_1(%arg0: i32, %arg1: i32, %arg2: i32) -> (i32, i32) {
    %c0_i32 = arith.constant 0 : i32
    return %arg2, %arg1 : i32, i32
  }
  func.func @transform_2(%arg0: i32, %arg1: i32, %arg2: i32) -> (i32, i32) {
    %c0_i32 = arith.constant 0 : i32
    return %arg0, %arg1 : i32, i32
  }
}

module attributes {stable_mosaic.version = 11 : i64} {
  func.func @score_loss_kernel(%arg0: i32, %arg1: memref<8x128xbf16, #tpu.memory_space<vmem>>, %arg2: memref<128x256xbf16, #tpu.memory_space<vmem>>, %arg3: memref<8x1xi32, #tpu.memory_space<vmem>>, %arg4: memref<8x1xf32, #tpu.memory_space<vmem>>, %arg5: memref<8x1xf32, #tpu.memory_space<vmem>>, %arg6: memref<8x1xf32, #tpu.memory_space<vmem>>, %arg7: memref<8x1xf32, #tpu.memory_space<vmem>>) attributes {dimension_semantics = [#tpu.dimension_semantics<arbitrary>], iteration_bounds = array<i64: 1>, scalar_prefetch = 0 : i64, scratch_operands = 3 : i64, tpu.core_type = #tpu.core_type<tc>, window_params = [{pipeline_mode = #tpu.pipeline_mode<synchronous>, transform_indices = @transform_0, window_bounds = array<i64: 8, 128>}, {transform_indices = @transform_1, window_bounds = array<i64: 128, 256>}, {pipeline_mode = #tpu.pipeline_mode<synchronous>, transform_indices = @transform_2, window_bounds = array<i64: 8, 1>}, {pipeline_mode = #tpu.pipeline_mode<synchronous>, transform_indices = @transform_3, window_bounds = array<i64: 8, 1>}]} {
    %c0_i32 = arith.constant 0 : i32
    %0 = arith.cmpi eq, %arg0, %c0_i32 : i32
    %1 = arith.extui %0 : i1 to i32
    %c0_i32_0 = arith.constant 0 : i32
    %2 = arith.cmpi ne, %1, %c0_i32_0 : i32
    scf.if %2 {
      %cst_25 = arith.constant -1.000000e+30 : f32
      %43 = vector.broadcast %cst_25 : f32 to vector<8x1xf32>
      %c0_26 = arith.constant 0 : index
      %c0_27 = arith.constant 0 : index
      %44 = vector.load %arg5[%c0_26, %c0_27] : memref<8x1xf32, #tpu.memory_space<vmem>>, vector<8x1xf32>
      tpu.vector_store %arg5[%c0_26, %c0_27], %43 {strides = array<i32>} : memref<8x1xf32, #tpu.memory_space<vmem>>, vector<8x1xf32>,
      %cst_28 = arith.constant 0.000000e+00 : f32
      %45 = vector.broadcast %cst_28 : f32 to vector<8x1xf32>
      %c0_29 = arith.constant 0 : index
      %c0_30 = arith.constant 0 : index
      %46 = vector.load %arg6[%c0_29, %c0_30] : memref<8x1xf32, #tpu.memory_space<vmem>>, vector<8x1xf32>
      tpu.vector_store %arg6[%c0_29, %c0_30], %45 {strides = array<i32>} : memref<8x1xf32, #tpu.memory_space<vmem>>, vector<8x1xf32>,
      %cst_31 = arith.constant 0.000000e+00 : f32
      %47 = vector.broadcast %cst_31 : f32 to vector<8x1xf32>
      %c0_32 = arith.constant 0 : index
      %c0_33 = arith.constant 0 : index
      %48 = vector.load %arg7[%c0_32, %c0_33] : memref<8x1xf32, #tpu.memory_space<vmem>>, vector<8x1xf32>
      tpu.vector_store %arg7[%c0_32, %c0_33], %47 {strides = array<i32>} : memref<8x1xf32, #tpu.memory_space<vmem>>, vector<8x1xf32>,
    } else {
    }
    %c0 = arith.constant 0 : index
    %c0_1 = arith.constant 0 : index
    %3 = vector.load %arg1[%c0, %c0_1] : memref<8x128xbf16, #tpu.memory_space<vmem>>, vector<8x128xbf16>
    %c0_2 = arith.constant 0 : index
    %c0_3 = arith.constant 0 : index
    %4 = vector.load %arg2[%c0_2, %c0_3] : memref<128x256xbf16, #tpu.memory_space<vmem>>, vector<128x256xbf16>
    %cst = arith.constant dense<0.000000e+00> : vector<8x256xf32>
    %5 = tpu.matmul %3, %4, %cst {dimension_numbers = #tpu.dot_dimension_numbers<[1], [0], [0], [1], [0, 0, 1, 1], [], []>} : vector<8x128xbf16>, vector<128x256xbf16>, vector<8x256xf32> -> vector<8x256xf32>
    %c256_i32 = arith.constant 256 : i32
    %6 = arith.muli %arg0, %c256_i32 : i32
    %7 = tpu.iota {dimensions = array<i32: 1>} : vector<8x256xi32>
    %8 = vector.broadcast %6 : i32 to vector<8x256xi32>
    %9 = arith.addi %8, %7 : vector<8x256xi32>
    %c24_i32 = arith.constant 24 : i32
    %10 = vector.broadcast %c24_i32 : i32 to vector<8x256xi32>
    %11 = arith.cmpi slt, %9, %10 : vector<8x256xi32>
    %cst_4 = arith.constant -1.000000e+30 : f32
    %12 = vector.broadcast %cst_4 : f32 to vector<8x256xf32>
    %13 = arith.select %11, %5, %12 : vector<8x256xi1>, vector<8x256xf32>
    %c0_5 = arith.constant 0 : index
    %c0_6 = arith.constant 0 : index
    %14 = vector.load %arg5[%c0_5, %c0_6] : memref<8x1xf32, #tpu.memory_space<vmem>>, vector<8x1xf32>
    %cst_7 = arith.constant dense<0xFF800000> : vector<8xf32>
    %15 = vector.multi_reduction <maximumf>, %13, %cst_7 [1] : vector<8x256xf32> to vector<8xf32>
    %16 = vector.shape_cast %15 : vector<8xf32> to vector<8x1xf32>
    %17 = arith.maximumf %14, %16 : vector<8x1xf32>
    %18 = arith.subf %14, %17 : vector<8x1xf32>
    %19 = math.exp %18 : vector<8x1xf32>
    %c0_8 = arith.constant 0 : index
    %c0_9 = arith.constant 0 : index
    %20 = vector.load %arg6[%c0_8, %c0_9] : memref<8x1xf32, #tpu.memory_space<vmem>>, vector<8x1xf32>
    %21 = arith.mulf %19, %20 : vector<8x1xf32>
    %22 = vector.broadcast %17 : vector<8x1xf32> to vector<8x256xf32>
    %23 = arith.subf %13, %22 : vector<8x256xf32>
    %24 = math.exp %23 : vector<8x256xf32>
    %cst_10 = arith.constant dense<0.000000e+00> : vector<8xf32>
    %25 = vector.multi_reduction <add>, %24, %cst_10 [1] : vector<8x256xf32> to vector<8xf32>
    %26 = vector.shape_cast %25 : vector<8xf32> to vector<8x1xf32>
    %27 = arith.addf %21, %26 : vector<8x1xf32>
    %c0_11 = arith.constant 0 : index
    %c0_12 = arith.constant 0 : index
    %28 = vector.load %arg6[%c0_11, %c0_12] : memref<8x1xf32, #tpu.memory_space<vmem>>, vector<8x1xf32>
    tpu.vector_store %arg6[%c0_11, %c0_12], %27 {strides = array<i32>} : memref<8x1xf32, #tpu.memory_space<vmem>>, vector<8x1xf32>,
    %c0_13 = arith.constant 0 : index
    %c0_14 = arith.constant 0 : index
    %29 = vector.load %arg5[%c0_13, %c0_14] : memref<8x1xf32, #tpu.memory_space<vmem>>, vector<8x1xf32>
    tpu.vector_store %arg5[%c0_13, %c0_14], %17 {strides = array<i32>} : memref<8x1xf32, #tpu.memory_space<vmem>>, vector<8x1xf32>,
    %c0_15 = arith.constant 0 : index
    %c0_16 = arith.constant 0 : index
    %30 = vector.load %arg7[%c0_15, %c0_16] : memref<8x1xf32, #tpu.memory_space<vmem>>, vector<8x1xf32>
    %c0_17 = arith.constant 0 : index
    %c0_18 = arith.constant 0 : index
    %31 = vector.load %arg3[%c0_17, %c0_18] : memref<8x1xi32, #tpu.memory_space<vmem>>, vector<8x1xi32>
    %32 = vector.broadcast %31 : vector<8x1xi32> to vector<8x256xi32>
    %33 = arith.cmpi eq, %9, %32 : vector<8x256xi32>
    %cst_19 = arith.constant 0.000000e+00 : f32
    %34 = vector.broadcast %cst_19 : f32 to vector<8x256xf32>
    %35 = arith.select %33, %13, %34 : vector<8x256xi1>, vector<8x256xf32>
    %cst_20 = arith.constant dense<0.000000e+00> : vector<8xf32>
    %36 = vector.multi_reduction <add>, %35, %cst_20 [1] : vector<8x256xf32> to vector<8xf32>
    %37 = vector.shape_cast %36 : vector<8xf32> to vector<8x1xf32>
    %38 = arith.addf %30, %37 : vector<8x1xf32>
    %c0_21 = arith.constant 0 : index
    %c0_22 = arith.constant 0 : index
    %39 = vector.load %arg7[%c0_21, %c0_22] : memref<8x1xf32, #tpu.memory_space<vmem>>, vector<8x1xf32>
    tpu.vector_store %arg7[%c0_21, %c0_22], %38 {strides = array<i32>} : memref<8x1xf32, #tpu.memory_space<vmem>>, vector<8x1xf32>,
    %c0_i32_23 = arith.constant 0 : i32
    %40 = arith.cmpi eq, %arg0, %c0_i32_23 : i32
    %41 = arith.extui %40 : i1 to i32
    %c0_i32_24 = arith.constant 0 : i32
    %42 = arith.cmpi ne, %41, %c0_i32_24 : i32
    scf.if %42 {
      %c0_25 = arith.constant 0 : index
      %c0_26 = arith.constant 0 : index
      %43 = vector.load %arg5[%c0_25, %c0_26] : memref<8x1xf32, #tpu.memory_space<vmem>>, vector<8x1xf32>
      %c0_27 = arith.constant 0 : index
      %c0_28 = arith.constant 0 : index
      %44 = vector.load %arg6[%c0_27, %c0_28] : memref<8x1xf32, #tpu.memory_space<vmem>>, vector<8x1xf32>
      %45 = math.log %44 : vector<8x1xf32>
      %46 = arith.addf %43, %45 : vector<8x1xf32>
      %c0_29 = arith.constant 0 : index
      %c0_30 = arith.constant 0 : index
      %47 = vector.load %arg7[%c0_29, %c0_30] : memref<8x1xf32, #tpu.memory_space<vmem>>, vector<8x1xf32>
      %48 = arith.subf %46, %47 : vector<8x1xf32>
      %c0_31 = arith.constant 0 : index
      %c0_32 = arith.constant 0 : index
      %49 = vector.load %arg4[%c0_31, %c0_32] : memref<8x1xf32, #tpu.memory_space<vmem>>, vector<8x1xf32>
      tpu.vector_store %arg4[%c0_31, %c0_32], %48 {strides = array<i32>} : memref<8x1xf32, #tpu.memory_space<vmem>>, vector<8x1xf32>,
    } else {
    }
    return
  }
  func.func @transform_0(%arg0: i32) -> (i32, i32) {
    %c0_i32 = arith.constant 0 : i32
    %c0_i32_0 = arith.constant 0 : i32
    %c0_i32_1 = arith.constant 0 : i32
    return %c0_i32, %c0_i32_0 : i32, i32
  }
  func.func @transform_1(%arg0: i32) -> (i32, i32) {
    %c0_i32 = arith.constant 0 : i32
    %c0_i32_0 = arith.constant 0 : i32
    return %c0_i32, %arg0 : i32, i32
  }
  func.func @transform_2(%arg0: i32) -> (i32, i32) {
    %c0_i32 = arith.constant 0 : i32
    %c0_i32_0 = arith.constant 0 : i32
    %c0_i32_1 = arith.constant 0 : i32
    return %c0_i32, %c0_i32_0 : i32, i32
  }
  func.func @transform_3(%arg0: i32) -> (i32, i32) {
    %c0_i32 = arith.constant 0 : i32
    %c0_i32_0 = arith.constant 0 : i32
    %c0_i32_1 = arith.constant 0 : i32
    return %c0_i32, %c0_i32_0 : i32, i32
  }
}

</mosaic_0001>

<bundles_post_ra>
// kernel: lightgcn_forward.3
= control target key start
LH: loop header
LB: loop body
LE: loop exit
PB: predicated region body
PF: predicated region fallthrough
CT: control target
= control target key end

     0   :  { %s1319_s1 = inlined_call_operand.vmem [shape: bf16[256,128], index: 1, kind: input, shape index: {}]   ;;  %s1320_s0 = inlined_call_operand.vmem [shape: bf16[256,256], index: 0, kind: input, shape index: {}]   ;;  %s1321_s2 = inlined_call_operand.vmem [shape: f32[256,128], index: 2, kind: output, shape index: {}]  }
   0x1   :  { %v943_v0 = vld [vmem:[%s1319_s1 + $0x38] sm:$0xff]  ;;  %v942_v2 = vld [vmem:[%s1319_s1 + $0x30] sm:$0xff]  ;;  %v941_v4 = vld [vmem:[%s1319_s1 + $0x28] sm:$0xff] }
   0x2   :  { %v951_v1 = vld [vmem:[%s1319_s1 + $0x78] sm:$0xff]  ;;  %399 = vmatpush.bf16.msra.mxu0 %v943_v0  ;;  %952 = vmatpush.bf16.msra.mxu2 %v943_v0  ;;  %v950_v3 = vld [vmem:[%s1319_s1 + $0x70] sm:$0xff]  ;;  %v949_v5 = vld [vmem:[%s1319_s1 + $0x68] sm:$0xff] }
   0x3   :  { %488 = vmatpush.bf16.msra.mxu1 %v951_v1  ;;  %960 = vmatpush.bf16.msra.mxu3 %v951_v1  ;;  %v940_v6 = vld [vmem:[%s1319_s1 + $0x20] sm:$0xff]  ;;  %v939_v8 = vld [vmem:[%s1319_s1 + $0x18] sm:$0xff]  ;;  %v938_v10 = vld [vmem:[%s1319_s1 + $0x10] sm:$0xff] }
   0x4   :  { %v948_v7 = vld [vmem:[%s1319_s1 + $0x60] sm:$0xff]  ;;  %v947_v9 = vld [vmem:[%s1319_s1 + $0x58] sm:$0xff]  ;;  %v946_v11 = vld [vmem:[%s1319_s1 + $0x50] sm:$0xff] }
   0x5   :  { %v937_v12 = vld [vmem:[%s1319_s1 + $0x8] sm:$0xff]  ;;  %v936_v14 = vld [vmem:[%s1319_s1] sm:$0xff]  ;;  %v722_v28 = vld [vmem:[%s1320_s0 + $0x10] sm:$0xf] }
   0x6   :  { %400 = vmatpush.bf16.msra.mxu0 %v942_v2  ;;  %953 = vmatpush.bf16.msra.mxu2 %v942_v2  ;;  %v945_v13 = vld [vmem:[%s1319_s1 + $0x48] sm:$0xff]  ;;  %v944_v15 = vld [vmem:[%s1319_s1 + $0x40] sm:$0xff]  ;;  %v907_v29 = vld [vmem:[%s1320_s0 + $0x14] sm:$0xf0] }
   0x7   :  { %489 = vmatpush.bf16.msra.mxu1 %v950_v3  ;;  %961 = vmatpush.bf16.msra.mxu3 %v950_v3  ;;  %v714_v16 = vld [vmem:[%s1320_s0] sm:$0xf]  ;;  %v905_v17 = vld [vmem:[%s1320_s0 + $0x4] sm:$0xf0]  ;;  %v904_v20 = vld [vmem:[%s1320_s0 + $0x4] sm:$0xf]  ;;  %v723_v36 = vor.u32 %v907_v29, %v722_v28 }
   0x8   :  { %v778_v18 = vld [vmem:[%s1320_s0 + $0x80] sm:$0xf]  ;;  %v921_v19 = vld [vmem:[%s1320_s0 + $0x84] sm:$0xf0]  ;;  %v716_v21 = vld [vmem:[%s1320_s0 + $0x8] sm:$0xf0]  ;;  %v715_v24 = vor.u32 %v905_v17, %v714_v16 }
   0x9   :  { %v920_v22 = vld [vmem:[%s1320_s0 + $0x84] sm:$0xf]  ;;  %v780_v23 = vld [vmem:[%s1320_s0 + $0x88] sm:$0xf0]  ;;  %v779_v25 = vor.u32 %v921_v19, %v778_v18  ;;  %v719_v26 = vor.u32 %v904_v20, %v716_v21  ;;  %v786_v30 = vld [vmem:[%s1320_s0 + $0x90] sm:$0xf] }
   0xa   :  { %401 = vmatpush.bf16.msra.mxu0 %v941_v4  ;;  %954 = vmatpush.bf16.msra.mxu2 %v941_v4  ;;  %v783_v27 = vor.u32 %v920_v22, %v780_v23  ;;  %v923_v31 = vld [vmem:[%s1320_s0 + $0x94] sm:$0xf0]  ;;  %v906_v32 = vld [vmem:[%s1320_s0 + $0x14] sm:$0xf]  ;;  %v724_v33 = vld [vmem:[%s1320_s0 + $0x18] sm:$0xf0] }
   0xb   :  { %490 = vmatpush.bf16.msra.mxu1 %v949_v5  ;;  %962 = vmatpush.bf16.msra.mxu3 %v949_v5  ;;  %v922_v34 = vld [vmem:[%s1320_s0 + $0x94] sm:$0xf]  ;;  %v788_v35 = vld [vmem:[%s1320_s0 + $0x98] sm:$0xf0]  ;;  %v787_v37 = vor.u32 %v923_v31, %v786_v30  ;;  %v727_v38 = vor.u32 %v906_v32, %v724_v33  ;;  %v730_v40 = vld [vmem:[%s1320_s0 + $0x20] sm:$0xf] }
   0xc   :  { %v791_v39 = vor.u32 %v922_v34, %v788_v35  ;;  %v909_v41 = vld [vmem:[%s1320_s0 + $0x24] sm:$0xf0]  ;;  %v794_v42 = vld [vmem:[%s1320_s0 + $0xa0] sm:$0xf]  ;;  %v908_v44 = vld [vmem:[%s1320_s0 + $0x24] sm:$0xf] }
   0xd   :  { %v925_v43 = vld [vmem:[%s1320_s0 + $0xa4] sm:$0xf0]  ;;  %v732_v45 = vld [vmem:[%s1320_s0 + $0x28] sm:$0xf0]  ;;  %v924_v46 = vld [vmem:[%s1320_s0 + $0xa4] sm:$0xf]  ;;  %v731_v48 = vor.u32 %v909_v41, %v730_v40 }
   0xe   :  { %402 = vmatpush.bf16.msra.mxu0 %v940_v6  ;;  %955 = vmatpush.bf16.msra.mxu2 %v940_v6  ;;  %v796_v47 = vld [vmem:[%s1320_s0 + $0xa8] sm:$0xf0]  ;;  %v795_v49 = vor.u32 %v925_v43, %v794_v42  ;;  %v735_v50 = vor.u32 %v908_v44, %v732_v45  ;;  %v738_v52 = vld [vmem:[%s1320_s0 + $0x30] sm:$0xf]  ;;  %v911_v53 = vld [vmem:[%s1320_s0 + $0x34] sm:$0xf0] }
   0xf   :  { %491 = vmatpush.bf16.msra.mxu1 %v948_v7  ;;  %963 = vmatpush.bf16.msra.mxu3 %v948_v7  ;;  %v799_v51 = vor.u32 %v924_v46, %v796_v47  ;;  %v802_v54 = vld [vmem:[%s1320_s0 + $0xb0] sm:$0xf]  ;;  %v927_v55 = vld [vmem:[%s1320_s0 + $0xb4] sm:$0xf0]  ;;  %v910_v56 = vld [vmem:[%s1320_s0 + $0x34] sm:$0xf]  ;;  %v739_v60 = vor.u32 %v911_v53, %v738_v52 }
  0x10   :  { %v740_v57 = vld [vmem:[%s1320_s0 + $0x38] sm:$0xf0]  ;;  %v926_v58 = vld [vmem:[%s1320_s0 + $0xb4] sm:$0xf]  ;;  %v803_v61 = vor.u32 %v927_v55, %v802_v54  ;;  %v746_v0 = vld [vmem:[%s1320_s0 + $0x40] sm:$0xf] }
  0x11   :  { %v804_v59 = vld [vmem:[%s1320_s0 + $0xb8] sm:$0xf0]  ;;  %v743_v62 = vor.u32 %v910_v56, %v740_v57  ;;  %v913_v1 = vld [vmem:[%s1320_s0 + $0x44] sm:$0xf0]  ;;  %v810_v2 = vld [vmem:[%s1320_s0 + $0xc0] sm:$0xf] }
  0x12   :  { %403 = vmatpush.bf16.msra.mxu0 %v939_v8  ;;  %956 = vmatpush.bf16.msra.mxu2 %v939_v8  ;;  %v807_v63 = vor.u32 %v926_v58, %v804_v59  ;;  %v929_v3 = vld [vmem:[%s1320_s0 + $0xc4] sm:$0xf0]  ;;  %v912_v4 = vld [vmem:[%s1320_s0 + $0x44] sm:$0xf]  ;;  %v748_v5 = vld [vmem:[%s1320_s0 + $0x48] sm:$0xf0]  ;;  %v747_v8 = vor.u32 %v913_v1, %v746_v0 }
  0x13   :  { %492 = vmatpush.bf16.msra.mxu1 %v947_v9  ;;  %964 = vmatpush.bf16.msra.mxu3 %v947_v9  ;;  %v928_v6 = vld [vmem:[%s1320_s0 + $0xc4] sm:$0xf]  ;;  %v812_v7 = vld [vmem:[%s1320_s0 + $0xc8] sm:$0xf0]  ;;  %v811_v9 = vor.u32 %v929_v3, %v810_v2  ;;  %v914_v16 = vld [vmem:[%s1320_s0 + $0x54] sm:$0xf] }
  0x14   :  { %v756_v17 = vld [vmem:[%s1320_s0 + $0x58] sm:$0xf0]  ;;  %v930_v18 = vld [vmem:[%s1320_s0 + $0xd4] sm:$0xf]  ;;  %v916_v28 = vld [vmem:[%s1320_s0 + $0x64] sm:$0xf] }
  0x15   :  { %v820_v19 = vld [vmem:[%s1320_s0 + $0xd8] sm:$0xf0]  ;;  %v759_v22 = vor.u32 %v914_v16, %v756_v17  ;;  %v764_v29 = vld [vmem:[%s1320_s0 + $0x68] sm:$0xf0]  ;;  %v932_v30 = vld [vmem:[%s1320_s0 + $0xe4] sm:$0xf] }
  0x16   :  { %404 = vmatpush.bf16.msra.mxu0 %v938_v10  ;;  %957 = vmatpush.bf16.msra.mxu2 %v938_v10  ;;  %v751_v10 = vor.u32 %v912_v4, %v748_v5  ;;  %v823_v23 = vor.u32 %v930_v18, %v820_v19  ;;  %v828_v31 = vld [vmem:[%s1320_s0 + $0xe8] sm:$0xf0]  ;;  %v767_v34 = vor.u32 %v916_v28, %v764_v29  ;;  %v918_v40 = vld [vmem:[%s1320_s0 + $0x74] sm:$0xf]  ;;  %v772_v41 = vld [vmem:[%s1320_s0 + $0x78] sm:$0xf0] }
  0x17   :  { %493 = vmatpush.bf16.msra.mxu1 %v946_v11  ;;  %965 = vmatpush.bf16.msra.mxu3 %v946_v11  ;;  %v815_v11 = vor.u32 %v928_v6, %v812_v7  ;;  %v831_v35 = vor.u32 %v932_v30, %v828_v31  ;;  %v934_v42 = vld [vmem:[%s1320_s0 + $0xf4] sm:$0xf]  ;;  %v836_v43 = vld [vmem:[%s1320_s0 + $0xf8] sm:$0xf0]  ;;  %v775_v46 = vor.u32 %v918_v40, %v772_v41 }
  0x18   :  { %v839_v47 = vor.u32 %v934_v42, %v836_v43 }
  0x1a   :  { %405 = vmatpush.bf16.msra.mxu0 %v937_v12  ;;  %958 = vmatpush.bf16.msra.mxu2 %v937_v12  ;;  %v754_v12 = vld [vmem:[%s1320_s0 + $0x50] sm:$0xf] }
  0x1b   :  { %494 = vmatpush.bf16.msra.mxu1 %v945_v13  ;;  %966 = vmatpush.bf16.msra.mxu3 %v945_v13  ;;  %v915_v13 = vld [vmem:[%s1320_s0 + $0x54] sm:$0xf0] }
  0x1c   :  { %v755_v20 = vor.u32 %v915_v13, %v754_v12 }
  0x1e   :  { %406 = vmatpush.bf16.msra.mxu0 %v936_v14  ;;  %959 = vmatpush.bf16.msra.mxu2 %v936_v14  ;;  %v818_v14 = vld [vmem:[%s1320_s0 + $0xd0] sm:$0xf] }
  0x1f   :  { %495 = vmatpush.bf16.msra.mxu1 %v944_v15  ;;  %967 = vmatpush.bf16.msra.mxu3 %v944_v15  ;;  %v931_v15 = vld [vmem:[%s1320_s0 + $0xd4] sm:$0xf0] }
  0x20   :  { %v819_v21 = vor.u32 %v931_v15, %v818_v14 }
  0x21   :  { %407 = vmatmul.bf16.vlgmr.msra.gmra.mxu0 %v715_v24  ;;  %447 = vmatmul.bf16.vlgmr.msra.gmra.mxu2 %v779_v25  ;;  %v762_v24 = vld [vmem:[%s1320_s0 + $0x60] sm:$0xf]  ;;  %v917_v25 = vld [vmem:[%s1320_s0 + $0x64] sm:$0xf0] }
  0x22   :  { %496 = vmatmul.bf16.vlgmr.msra.gmra.mxu1 %v719_v26  ;;  %536 = vmatmul.bf16.vlgmr.msra.gmra.mxu3 %v783_v27  ;;  %v826_v26 = vld [vmem:[%s1320_s0 + $0xe0] sm:$0xf]  ;;  %v933_v27 = vld [vmem:[%s1320_s0 + $0xe4] sm:$0xf0]  ;;  %v763_v32 = vor.u32 %v917_v25, %v762_v24 }
  0x23   :  { %v827_v33 = vor.u32 %v933_v27, %v826_v26 }
  0x31   :  { %412 = vmatmul.bf16.gmra.mxu0 %v723_v36  ;;  %452 = vmatmul.bf16.gmra.mxu2 %v787_v37  ;;  %v770_v36 = vld [vmem:[%s1320_s0 + $0x70] sm:$0xf]  ;;  %v919_v37 = vld [vmem:[%s1320_s0 + $0x74] sm:$0xf0] }
  0x32   :  { %501 = vmatmul.bf16.gmra.mxu1 %v727_v38  ;;  %541 = vmatmul.bf16.gmra.mxu3 %v791_v39  ;;  %v834_v38 = vld [vmem:[%s1320_s0 + $0xf0] sm:$0xf]  ;;  %v935_v39 = vld [vmem:[%s1320_s0 + $0xf4] sm:$0xf0]  ;;  %v771_v44 = vor.u32 %v919_v37, %v770_v36 }
  0x33   :  { %v835_v45 = vor.u32 %v935_v39, %v834_v38 }
  0x41   :  { %417 = vmatmul.bf16.gmra.mxu0 %v731_v48  ;;  %457 = vmatmul.bf16.gmra.mxu2 %v795_v49 }
  0x42   :  { %506 = vmatmul.bf16.gmra.mxu1 %v735_v50  ;;  %546 = vmatmul.bf16.gmra.mxu3 %v799_v51 }
  0x51   :  { %422 = vmatmul.bf16.gmra.mxu0 %v739_v60  ;;  %462 = vmatmul.bf16.gmra.mxu2 %v803_v61 }
  0x52   :  { %511 = vmatmul.bf16.gmra.mxu1 %v743_v62  ;;  %551 = vmatmul.bf16.gmra.mxu3 %v807_v63 }
  0x61   :  { %427 = vmatmul.bf16.gmra.mxu0 %v747_v8  ;;  %467 = vmatmul.bf16.gmra.mxu2 %v811_v9 }
  0x62   :  { %516 = vmatmul.bf16.gmra.mxu1 %v751_v10  ;;  %556 = vmatmul.bf16.gmra.mxu3 %v815_v11 }
  0x71   :  { %432 = vmatmul.bf16.gmra.mxu0 %v755_v20  ;;  %472 = vmatmul.bf16.gmra.mxu2 %v819_v21 }
  0x72   :  { %521 = vmatmul.bf16.gmra.mxu1 %v759_v22  ;;  %561 = vmatmul.bf16.gmra.mxu3 %v823_v23 }
  0x81   :  { %437 = vmatmul.bf16.gmra.mxu0 %v763_v32  ;;  %477 = vmatmul.bf16.gmra.mxu2 %v827_v33 }
  0x82   :  { %526 = vmatmul.bf16.gmra.mxu1 %v767_v34  ;;  %566 = vmatmul.bf16.gmra.mxu3 %v831_v35 }
  0x91   :  { %442 = vmatmul.bf16.gmra.mxu0 %v771_v44  ;;  %482 = vmatmul.bf16.gmra.mxu2 %v835_v45 }
  0x92   :  { %531 = vmatmul.bf16.gmra.mxu1 %v775_v46  ;;  %571 = vmatmul.bf16.gmra.mxu3 %v839_v47 }
  0x9e   :  { %v408_v48 = vpop.f32.mrf.mxu0 }
  0x9f   :  { %v497_v49 = vpop.f32.mrf.mxu1 }
  0xa0   :  { %v498_v50 = vadd.f32 %v497_v49, %v408_v48 }
  0xa2   :  { %676 = vst [vmem:[%s1321_s2] sm:$0xff] %v498_v50 }
  0xa4   :  { %v448_v51 = vpop.f32.mrf.mxu2 }
  0xa5   :  { %v537_v52 = vpop.f32.mrf.mxu3 }
  0xa6   :  { %v538_v53 = vadd.f32 %v537_v52, %v448_v51  ;;  %v410_v54 = vpop.f32.mrf.mxu0 }
  0xa7   :  { %v499_v55 = vpop.f32.mrf.mxu1 }
  0xa8   :  { %692 = vst [vmem:[%s1321_s2 + $0x80] sm:$0xff] %v538_v53  ;;  %v500_v56 = vadd.f32 %v499_v55, %v410_v54 }
  0xaa   :  { %677 = vst [vmem:[%s1321_s2 + $0x8] sm:$0xff] %v500_v56 }
  0xac   :  { %v450_v57 = vpop.f32.mrf.mxu2 }
  0xad   :  { %v539_v58 = vpop.f32.mrf.mxu3 }
  0xae   :  { %v540_v59 = vadd.f32 %v539_v58, %v450_v57  ;;  %v413_v60 = vpop.f32.mrf.mxu0 }
  0xaf   :  { %v502_v61 = vpop.f32.mrf.mxu1 }
  0xb0   :  { %693 = vst [vmem:[%s1321_s2 + $0x88] sm:$0xff] %v540_v59  ;;  %v503_v62 = vadd.f32 %v502_v61, %v413_v60 }
  0xb2   :  { %678 = vst [vmem:[%s1321_s2 + $0x10] sm:$0xff] %v503_v62 }
  0xb4   :  { %v453_v63 = vpop.f32.mrf.mxu2 }
  0xb5   :  { %v542_v0 = vpop.f32.mrf.mxu3 }
  0xb6   :  { %v543_v1 = vadd.f32 %v542_v0, %v453_v63  ;;  %v415_v2 = vpop.f32.mrf.mxu0 }
  0xb7   :  { %v504_v3 = vpop.f32.mrf.mxu1 }
  0xb8   :  { %694 = vst [vmem:[%s1321_s2 + $0x90] sm:$0xff] %v543_v1  ;;  %v505_v4 = vadd.f32 %v504_v3, %v415_v2 }
  0xba   :  { %679 = vst [vmem:[%s1321_s2 + $0x18] sm:$0xff] %v505_v4 }
  0xbc   :  { %v455_v5 = vpop.f32.mrf.mxu2 }
  0xbd   :  { %v544_v6 = vpop.f32.mrf.mxu3 }
  0xbe   :  { %v545_v7 = vadd.f32 %v544_v6, %v455_v5  ;;  %v418_v8 = vpop.f32.mrf.mxu0 }
  0xbf   :  { %v507_v9 = vpop.f32.mrf.mxu1 }
  0xc0   :  { %695 = vst [vmem:[%s1321_s2 + $0x98] sm:$0xff] %v545_v7  ;;  %v508_v10 = vadd.f32 %v507_v9, %v418_v8 }
  0xc2   :  { %680 = vst [vmem:[%s1321_s2 + $0x20] sm:$0xff] %v508_v10 }
  0xc4   :  { %v458_v11 = vpop.f32.mrf.mxu2 }
  0xc5   :  { %v547_v12 = vpop.f32.mrf.mxu3 }
  0xc6   :  { %v548_v13 = vadd.f32 %v547_v12, %v458_v11  ;;  %v420_v14 = vpop.f32.mrf.mxu0 }
  0xc7   :  { %v509_v15 = vpop.f32.mrf.mxu1 }
  0xc8   :  { %696 = vst [vmem:[%s1321_s2 + $0xa0] sm:$0xff] %v548_v13  ;;  %v510_v16 = vadd.f32 %v509_v15, %v420_v14 }
  0xca   :  { %681 = vst [vmem:[%s1321_s2 + $0x28] sm:$0xff] %v510_v16 }
  0xcc   :  { %v460_v17 = vpop.f32.mrf.mxu2 }
  0xcd   :  { %v549_v18 = vpop.f32.mrf.mxu3 }
  0xce   :  { %v550_v19 = vadd.f32 %v549_v18, %v460_v17  ;;  %v423_v20 = vpop.f32.mrf.mxu0 }
  0xcf   :  { %v512_v21 = vpop.f32.mrf.mxu1 }
  0xd0   :  { %697 = vst [vmem:[%s1321_s2 + $0xa8] sm:$0xff] %v550_v19  ;;  %v513_v22 = vadd.f32 %v512_v21, %v423_v20 }
  0xd2   :  { %682 = vst [vmem:[%s1321_s2 + $0x30] sm:$0xff] %v513_v22 }
  0xd4   :  { %v463_v23 = vpop.f32.mrf.mxu2 }
  0xd5   :  { %v552_v24 = vpop.f32.mrf.mxu3 }
  0xd6   :  { %v553_v25 = vadd.f32 %v552_v24, %v463_v23  ;;  %v425_v26 = vpop.f32.mrf.mxu0 }
  0xd7   :  { %v514_v27 = vpop.f32.mrf.mxu1 }
  0xd8   :  { %698 = vst [vmem:[%s1321_s2 + $0xb0] sm:$0xff] %v553_v25  ;;  %v515_v28 = vadd.f32 %v514_v27, %v425_v26 }
  0xda   :  { %683 = vst [vmem:[%s1321_s2 + $0x38] sm:$0xff] %v515_v28 }
  0xdc   :  { %v465_v29 = vpop.f32.mrf.mxu2 }
  0xdd   :  { %v554_v30 = vpop.f32.mrf.mxu3 }
  0xde   :  { %v555_v31 = vadd.f32 %v554_v30, %v465_v29  ;;  %v428_v32 = vpop.f32.mrf.mxu0 }
  0xdf   :  { %v517_v33 = vpop.f32.mrf.mxu1 }
  0xe0   :  { %699 = vst [vmem:[%s1321_s2 + $0xb8] sm:$0xff] %v555_v31  ;;  %v518_v34 = vadd.f32 %v517_v33, %v428_v32 }
  0xe2   :  { %684 = vst [vmem:[%s1321_s2 + $0x40] sm:$0xff] %v518_v34 }
  0xe4   :  { %v468_v35 = vpop.f32.mrf.mxu2 }
  0xe5   :  { %v557_v36 = vpop.f32.mrf.mxu3 }
  0xe6   :  { %v558_v37 = vadd.f32 %v557_v36, %v468_v35  ;;  %v430_v38 = vpop.f32.mrf.mxu0 }
  0xe7   :  { %v519_v39 = vpop.f32.mrf.mxu1 }
  0xe8   :  { %700 = vst [vmem:[%s1321_s2 + $0xc0] sm:$0xff] %v558_v37  ;;  %v520_v40 = vadd.f32 %v519_v39, %v430_v38 }
  0xea   :  { %685 = vst [vmem:[%s1321_s2 + $0x48] sm:$0xff] %v520_v40 }
  0xec   :  { %v470_v41 = vpop.f32.mrf.mxu2 }
  0xed   :  { %v559_v42 = vpop.f32.mrf.mxu3 }
  0xee   :  { %v560_v43 = vadd.f32 %v559_v42, %v470_v41  ;;  %v433_v44 = vpop.f32.mrf.mxu0 }
  0xef   :  { %v522_v45 = vpop.f32.mrf.mxu1 }
  0xf0   :  { %701 = vst [vmem:[%s1321_s2 + $0xc8] sm:$0xff] %v560_v43  ;;  %v523_v46 = vadd.f32 %v522_v45, %v433_v44 }
  0xf2   :  { %686 = vst [vmem:[%s1321_s2 + $0x50] sm:$0xff] %v523_v46 }
  0xf4   :  { %v473_v47 = vpop.f32.mrf.mxu2 }
  0xf5   :  { %v562_v48 = vpop.f32.mrf.mxu3 }
  0xf6   :  { %v563_v49 = vadd.f32 %v562_v48, %v473_v47  ;;  %v435_v50 = vpop.f32.mrf.mxu0 }
  0xf7   :  { %v524_v51 = vpop.f32.mrf.mxu1 }
  0xf8   :  { %702 = vst [vmem:[%s1321_s2 + $0xd0] sm:$0xff] %v563_v49  ;;  %v525_v52 = vadd.f32 %v524_v51, %v435_v50 }
  0xfa   :  { %687 = vst [vmem:[%s1321_s2 + $0x58] sm:$0xff] %v525_v52 }
  0xfc   :  { %v475_v53 = vpop.f32.mrf.mxu2 }
  0xfd   :  { %v564_v54 = vpop.f32.mrf.mxu3 }
  0xfe   :  { %v565_v55 = vadd.f32 %v564_v54, %v475_v53  ;;  %v438_v56 = vpop.f32.mrf.mxu0 }
  0xff   :  { %v527_v57 = vpop.f32.mrf.mxu1 }
 0x100   :  { %703 = vst [vmem:[%s1321_s2 + $0xd8] sm:$0xff] %v565_v55  ;;  %v528_v58 = vadd.f32 %v527_v57, %v438_v56 }
 0x102   :  { %688 = vst [vmem:[%s1321_s2 + $0x60] sm:$0xff] %v528_v58 }
 0x104   :  { %v478_v59 = vpop.f32.mrf.mxu2 }
 0x105   :  { %v567_v60 = vpop.f32.mrf.mxu3 }
 0x106   :  { %v568_v61 = vadd.f32 %v567_v60, %v478_v59  ;;  %v440_v62 = vpop.f32.mrf.mxu0 }
 0x107   :  { %v529_v63 = vpop.f32.mrf.mxu1 }
 0x108   :  { %704 = vst [vmem:[%s1321_s2 + $0xe0] sm:$0xff] %v568_v61  ;;  %v530_v0 = vadd.f32 %v529_v63, %v440_v62 }
 0x10a   :  { %689 = vst [vmem:[%s1321_s2 + $0x68] sm:$0xff] %v530_v0 }
 0x10c   :  { %v480_v1 = vpop.f32.mrf.mxu2 }
 0x10d   :  { %v569_v2 = vpop.f32.mrf.mxu3 }
 0x10e   :  { %v570_v3 = vadd.f32 %v569_v2, %v480_v1  ;;  %v443_v4 = vpop.f32.mrf.mxu0 }
 0x10f   :  { %v532_v5 = vpop.f32.mrf.mxu1 }
 0x110   :  { %705 = vst [vmem:[%s1321_s2 + $0xe8] sm:$0xff] %v570_v3  ;;  %v533_v6 = vadd.f32 %v532_v5, %v443_v4 }
 0x112   :  { %690 = vst [vmem:[%s1321_s2 + $0x70] sm:$0xff] %v533_v6 }
 0x114   :  { %v483_v7 = vpop.f32.mrf.mxu2 }
 0x115   :  { %v572_v8 = vpop.f32.mrf.mxu3 }
 0x116   :  { %v573_v9 = vadd.f32 %v572_v8, %v483_v7  ;;  %v445_v10 = vpop.f32.mrf.mxu0 }
 0x117   :  { %v534_v11 = vpop.f32.mrf.mxu1 }
 0x118   :  { %706 = vst [vmem:[%s1321_s2 + $0xf0] sm:$0xff] %v573_v9  ;;  %v535_v12 = vadd.f32 %v534_v11, %v445_v10 }
 0x11a   :  { %691 = vst [vmem:[%s1321_s2 + $0x78] sm:$0xff] %v535_v12 }
 0x11c   :  { %v485_v13 = vpop.f32.mrf.mxu2 }
 0x11d   :  { %v574_v14 = vpop.f32.mrf.mxu3 }
 0x11e   :  { %v575_v15 = vadd.f32 %v574_v14, %v485_v13 }
 0x120   :  { %707 = vst [vmem:[%s1321_s2 + $0xf8] sm:$0xff] %v575_v15 }

// kernel: lightgcn_forward.5
= control target key start
LH: loop header
LB: loop body
LE: loop exit
PB: predicated region body
PF: predicated region fallthrough
CT: control target
= control target key end

     0   :  { %v306_v9 = vmov 0   ;;  %vm18_vm0 = vcmask 7168   ;;  %v307_v27 = vmov 0.0   ;;  %v308_v28 = vmov -1e+30   ;;  %s445_s1 = inlined_call_operand.vmem [shape: bf16[128,256], index: 1, kind: input, shape index: {}]   ;;  %s446_s2 = inlined_call_operand.vmem [shape: s32[8,1], index: 2, kind: input, shape index: {}]   ;;  %s447_s0 = inlined_call_operand.vmem [shape: bf16[8,128], index: 0, kind: input, shape index: {}]   ;;  %s448_s3 = inlined_call_operand.vmem [shape: f32[8,1], index: 3, kind: output, shape index: {}]  }
   0x1   :  { %v271_v0 = vld [vmem:[%s445_s1 + $0x70] sm:$0xf]  ;;  %v292_v1 = vld [vmem:[%s445_s1 + $0x74] sm:$0xf0]  ;;  %v263_v2 = vld [vmem:[%s445_s1 + $0x60] sm:$0xf]  ;;  %297 = vset.pattern.permute.xlu1 %v306_v9  ;;  %296 = vset.pattern.permute.xlu0 %v306_v9  ;;  %v146_v29 = vlaneseq }
   0x2   :  { %v272_v3 = vor.u32 %v292_v1, %v271_v0  ;;  %v290_v4 = vld [vmem:[%s445_s1 + $0x64] sm:$0xf0]  ;;  %v255_v6 = vld [vmem:[%s445_s1 + $0x50] sm:$0xf]  ;;  %v288_v7 = vld [vmem:[%s445_s1 + $0x54] sm:$0xf0] }
   0x3   :  { %v264_v5 = vor.u32 %v290_v4, %v263_v2  ;;  %v185_v8 = vld [vmem:[%s446_s2] sm:$0xff]  ;;  %v256_v10 = vor.u32 %v288_v7, %v255_v6  ;;  %v286_v12 = vld [vmem:[%s445_s1 + $0x44] sm:$0xf0]  ;;  %v239_v14 = vld [vmem:[%s445_s1 + $0x30] sm:$0xf]  ;;  %20 = vst.msk [vmem:[#allocation3] sm:$0xff] %vm18_vm0, %v307_v27 }
   0x4   :  { %119 = vmatpush.bf16.msra.mxu0 %v272_v3  ;;  %187 = vperm.xlu1 %297, %v185_v8   ;;  %v247_v11 = vld [vmem:[%s445_s1 + $0x40] sm:$0xf]  ;;  %v284_v15 = vld [vmem:[%s445_s1 + $0x34] sm:$0xf0]  ;;  %v282_v18 = vld [vmem:[%s445_s1 + $0x24] sm:$0xf0] }
   0x5   :  { %v248_v13 = vor.u32 %v286_v12, %v247_v11  ;;  %v240_v16 = vor.u32 %v284_v15, %v239_v14  ;;  %v231_v17 = vld [vmem:[%s445_s1 + $0x20] sm:$0xf]  ;;  %v223_v20 = vld [vmem:[%s445_s1 + $0x10] sm:$0xf]  ;;  %v280_v21 = vld [vmem:[%s445_s1 + $0x14] sm:$0xf0] }
   0x6   :  { %v232_v19 = vor.u32 %v282_v18, %v231_v17  ;;  %v224_v22 = vor.u32 %v280_v21, %v223_v20  ;;  %v215_v23 = vld [vmem:[%s445_s1] sm:$0xf]  ;;  %v278_v24 = vld [vmem:[%s445_s1 + $0x4] sm:$0xf0]  ;;  %21 = vst.msk [vmem:[#allocation4] sm:$0xff] %vm18_vm0, %v307_v27  ;;  %v147_v30 = vand.u32 127, %v146_v29 }
   0x7   :  { %v216_v25 = vor.u32 %v278_v24, %v215_v23  ;;  %v383_v26 = vld [vmem:[%s447_s0] sm:$0xf]  ;;  %19 = vst.msk [vmem:[#allocation2] sm:$0xff] %vm18_vm0, %v308_v28  ;;  %v291_v40 = vld [vmem:[%s445_s1 + $0x74] sm:$0xf] }
   0x8   :  { %120 = vmatpush.bf16.msra.mxu0 %v264_v5  ;;  %v148_v31 = vadd.s32 128, %v147_v30  ;;  %vm152_vm2 = vcmp.lt.s32.totalorder %v147_v30, 24  ;;  %v273_v41 = vld [vmem:[%s445_s1 + $0x78] sm:$0xf0]  ;;  %v289_v42 = vld [vmem:[%s445_s1 + $0x64] sm:$0xf] }
   0x9   :  { %v276_v43 = vor.u32 %v291_v40, %v273_v41  ;;  %v265_v44 = vld [vmem:[%s445_s1 + $0x68] sm:$0xf0]  ;;  %v287_v46 = vld [vmem:[%s445_s1 + $0x54] sm:$0xf]  ;;  %v257_v47 = vld [vmem:[%s445_s1 + $0x58] sm:$0xf0] }
   0xa   :  { %v268_v45 = vor.u32 %v289_v42, %v265_v44  ;;  %v260_v48 = vor.u32 %v287_v46, %v257_v47  ;;  %v285_v49 = vld [vmem:[%s445_s1 + $0x44] sm:$0xf]  ;;  %v249_v50 = vld [vmem:[%s445_s1 + $0x48] sm:$0xf0]  ;;  %v283_v52 = vld [vmem:[%s445_s1 + $0x34] sm:$0xf] }
   0xb   :  { %132 = vmatpush.bf16.msra.mxu1 %v276_v43  ;;  %v252_v51 = vor.u32 %v285_v49, %v249_v50  ;;  %v241_v53 = vld [vmem:[%s445_s1 + $0x38] sm:$0xf0]  ;;  %v281_v62 = vld [vmem:[%s445_s1 + $0x24] sm:$0xf]  ;;  %v233_v63 = vld [vmem:[%s445_s1 + $0x28] sm:$0xf0] }
   0xc   :  { %121 = vmatpush.bf16.msra.mxu0 %v256_v10  ;;  %v244_v54 = vor.u32 %v283_v52, %v241_v53  ;;  %v236_v0 = vor.u32 %v281_v62, %v233_v63  ;;  %v279_v1 = vld [vmem:[%s445_s1 + $0x14] sm:$0xf]  ;;  %v225_v2 = vld [vmem:[%s445_s1 + $0x18] sm:$0xf0]  ;;  %v277_v4 = vld [vmem:[%s445_s1 + $0x4] sm:$0xf] }
   0xd   :  { %v184_v56 = vld [vmem:[#allocation4] sm:$0xff]  ;;  %v228_v3 = vor.u32 %v279_v1, %v225_v2  ;;  %v217_v5 = vld [vmem:[%s445_s1 + $0x8] sm:$0xf0] }
   0xe   :  { %v156_v55 = vld [vmem:[#allocation2] sm:$0xff]  ;;  %v220_v6 = vor.u32 %v277_v4, %v217_v5 }
   0xf   :  { %133 = vmatpush.bf16.msra.mxu1 %v268_v45 }
  0x10   :  { %122 = vmatpush.bf16.msra.mxu0 %v248_v13 }
  0x13   :  { %134 = vmatpush.bf16.msra.mxu1 %v260_v48 }
  0x14   :  { %123 = vmatpush.bf16.msra.mxu0 %v240_v16 }
  0x17   :  { %135 = vmatpush.bf16.msra.mxu1 %v252_v51 }
  0x18   :  { %124 = vmatpush.bf16.msra.mxu0 %v232_v19  ;;  %v164_v19 = vld [vmem:[#allocation3] sm:$0xff] }
  0x1b   :  { %136 = vmatpush.bf16.msra.mxu1 %v244_v54 }
  0x1c   :  { %125 = vmatpush.bf16.msra.mxu0 %v224_v22 }
  0x1f   :  { %137 = vmatpush.bf16.msra.mxu1 %v236_v0 }
  0x20   :  { %126 = vmatpush.bf16.msra.mxu0 %v216_v25 }
  0x23   :  { %127 = vmatmul.bf16.vlgmr.msra.gmra.mxu0 %v383_v26  ;;  %138 = vmatpush.bf16.msra.mxu1 %v228_v3 }
  0x27   :  { %139 = vmatpush.bf16.msra.mxu1 %v220_v6 }
  0x2a   :  { %140 = vmatmul.bf16.vlgmr.msra.gmra.mxu1 %v383_v26 }
  0x76   :  { %v188_v32 = vpop.permute.xlu1 %187 }
  0x77   :  { %vm190_vm1 = vcmp.eq.s32.totalorder %v148_v31, %v188_v32  ;;  %vm189_vm3 = vcmp.eq.s32.totalorder %v147_v30, %v188_v32 }
  0x78   :  { %v192_v34 = vsel %vm190_vm1, -1e+30, %v307_v27 }
  0xa0   :  { %v128_v33 = vpop.f32.mrf.mxu0 }
  0xa1   :  { %v154_v35 = vsel %vm152_vm2, %v128_v33, -1e+30 }
  0xa2   :  { %v157_v36 = vmax.f32 %v154_v35, -1e+30  ;;  %v191_v37 = vsel %vm189_vm3, %v154_v35, 0.0 }
  0xa3   :  { %v193_v38 = vadd.f32 %v192_v34, %v191_v37 }
  0xa4   :  { %158 = vmax.xlane.f32.xlu0 %v157_v36 }
  0xa5   :  { %194 = vadd.xlane.f32.xlu2 %v193_v38 }
  0xa7   :  { %v141_v15 = vpop.f32.mrf.mxu1 }
  0xa8   :  { %v130_v39 = vpop.f32.mrf.mxu0 }
  0xaf   :  { %v143_v16 = vpop.f32.mrf.mxu1 }
 0x117   :  { %v159_v57 = vpop.xlane.xlu0 %158 }
 0x118   :  { %v160_v58 = vmax.f32 %v156_v55, %v159_v57  ;;  %v195_v59 = vpop.xlane.xlu2 %194 }
 0x119   :  { %v196_v60 = vadd.f32 %v195_v59, %v184_v56 }
 0x11a   :  { %v161_v61 = vsub.f32 %v156_v55, %v160_v58  ;;  %183 = vst.msk [vmem:[#allocation2] sm:$0xff] %vm18_vm0, %v160_v58  ;;  %168 = vperm.xlu0 %296, %v160_v58  }
 0x11b   :  { %197 = vst.msk [vmem:[#allocation4] sm:$0xff] %vm18_vm0, %v196_v60 }
 0x11c   :  { %v162_v17 = vmul.f32 1.442695, %v161_v61 }
 0x121   :  { %v201_v26 = vld [vmem:[#allocation2] sm:$0xff] }
 0x122   :  { %v206_v28 = vld [vmem:[#allocation4] sm:$0xff] }
 0x18c   :  { %v169_v7 = vpop.permute.xlu0 %168 }
 0x18d   :  { %v171_v8 = vsub.f32 %v154_v35, %v169_v7  ;;  %v172_v9 = vsub.f32 -1e+30, %v169_v7 }
 0x18f   :  { %v173_v10 = vmul.f32 1.442695, %v171_v8  ;;  %v175_v11 = vmul.f32 1.442695, %v172_v9 }
 0x191   :  { %298 = vpow2.f32 %v173_v10 }
 0x192   :  { %300 = vpow2.f32 %v175_v11 }
 0x193   :  { %302 = vpow2.f32 %v162_v17 }
 0x197   :  { %v299_v12 = vpop.eup %298 }
 0x198   :  { %v301_v13 = vpop.eup %300 }
 0x199   :  { %v177_v14 = vadd.f32 %v301_v13, %v299_v12  ;;  %v303_v18 = vpop.eup %302 }
 0x19a   :  { %v165_v20 = vmul.f32 %v303_v18, %v164_v19 }
 0x19b   :  { %178 = vadd.xlane.f32.xlu1 %v177_v14 }
 0x20e   :  { %v179_v21 = vpop.xlane.xlu1 %178 }
 0x20f   :  { %v180_v22 = vadd.f32 %v179_v21, %v165_v20 }
 0x211   :  { %182 = vst.msk [vmem:[#allocation3] sm:$0xff] %vm18_vm0, %v180_v22 }
 0x218   :  { %v202_v23 = vld [vmem:[#allocation3] sm:$0xff] }
 0x219   :  { %304 = vlog2.f32 %v202_v23 }
 0x21f   :  { %v305_v24 = vpop.eup %304 }
 0x220   :  { %v204_v25 = vmul.f32 0.6931472, %v305_v24 }
 0x222   :  { %v205_v27 = vadd.f32 %v204_v25, %v201_v26 }
 0x224   :  { %v207_v29 = vsub.f32 %v205_v27, %v206_v28 }
 0x226   :  { %208 = vst.msk [vmem:[%s448_s3] sm:$0xff] %vm18_vm0, %v207_v29 }

</bundles_post_ra>
